<compile_context>
chip_gen: v6e
topology: v6e:2x2x1
jax: 0.10.0
libtpu: 0.0.40
codegen_flags: <defaults>
</compile_context>

<pallas_src>
import functools

import jax
import jax.numpy as jnp
from jax.experimental import pallas as pl
from jax.experimental.pallas import tpu as pltpu


def _round_up(x, m):
    return (x + m - 1) // m * m


# ----------------------------- kernels ------------------------------------ #

def _conv_pool_kernel(x_ref, w1_ref, b1_ref, w2_ref, b2_ref, w3_ref, b3_ref,
                      out_ref, *, tb, n_pad):
    """Per-point conv stack + per-cloud max pool for TB point clouds.

    x_ref:   (TB * n_pad, 3)  points of TB clouds, channels-last
    w*_ref:  zero-padded weights; output-channel (lane) dims are x128
    b*_ref:  (1, C_pad) float32 biases (broadcast over sublanes)
    out_ref: (TB, H_pad)      pooled features, lane-dense 2-D block
    """
    cdt = w1_ref.dtype
    x = x_ref[...]
    # 1x1 convs == per-point matmuls (MXU) + bias + ReLU (VPU, f32)
    h = jnp.dot(x, w1_ref[...], preferred_element_type=jnp.float32) + b1_ref[...]
    h = jnp.maximum(h, 0.0)
    h = jnp.dot(h.astype(cdt), w2_ref[...],
                preferred_element_type=jnp.float32) + b2_ref[...]
    h = jnp.maximum(h, 0.0)
    h = jnp.dot(h.astype(cdt), w3_ref[...],
                preferred_element_type=jnp.float32) + b3_ref[...]
    h = jnp.maximum(h, 0.0)                               # (TB*n_pad, H_pad)

    # grouped max-pool over the point axis (torch.max(x, -1)[0]);
    # static, sublane-aligned slices (n_pad is a multiple of 8)
    parts = [jnp.max(h[b * n_pad:(b + 1) * n_pad], axis=0, keepdims=True)
             for b in range(tb)]
    pooled = parts[0] if tb == 1 else jnp.concatenate(parts, axis=0)
    out_ref[...] = pooled                                 # unmasked (TB, H_pad) store


def _mlp_head_kernel(g_ref, w4_ref, b4_ref, w5_ref, b5_ref, out_ref):
    """Linear -> ReLU -> Linear -> ReLU over a (TBH, H_pad) batch slab."""
    cdt = w4_ref.dtype
    g = g_ref[...]
    y = jnp.dot(g.astype(cdt), w4_ref[...],
                preferred_element_type=jnp.float32) + b4_ref[...]
    y = jnp.maximum(y, 0.0)
    y = jnp.dot(y.astype(cdt), w5_ref[...],
                preferred_element_type=jnp.float32) + b5_ref[...]
    out_ref[...] = jnp.maximum(y, 0.0)


# ----------------------------- wrapper ------------------------------------ #

_PARAM_ORDER = ("w1", "b1", "w2", "b2", "w3", "b3", "w4", "b4", "w5", "b5")


def _pick_batch_tile(batch, n_pad, f_p, f2_p, h_p):
    """Batch tile TB: multiple of 8, capped by a v7x-safe VMEM budget."""
    # f32 VMEM footprint of one point cloud in the conv stage:
    # double-buffered (n_pad, 3) input block + the three live activations.
    per_cloud = 4 * n_pad * (2 * 3 + f_p + f2_p + h_p)
    vmem_budget = 24 * 1024 * 1024          # conservative for v7x's 64 MiB VMEM
    tb = max(8, min(64, vmem_budget // per_cloud) // 8 * 8)
    tb = min(tb, _round_up(batch, 8))       # no more padding rows than needed
    # prefer >=2 grid steps when the batch allows, so both v7x TCs get work
    if batch >= 16 and _round_up(batch, tb) // tb < 2:
        tb = max(8, _round_up((batch + 1) // 2, 8))
    return tb


def point_cloud_encoder(state, params, *, conv_dtype=jnp.float32):
    """state: (B, 3, N) float32 (PyTorch NCL layout). Returns (B, hid_size)."""
    B, cin, N = state.shape
    assert cin == 3, "PointCloudEncoder expects 3 input channels"
    F = params["w1"].shape[1]
    H = params["w5"].shape[1]
    F_p = _round_up(F, 128)
    F2_p = _round_up(2 * F, 128)
    H_p = _round_up(H, 128)
    N_pad = _round_up(N, 8)

    TB = _pick_batch_tile(B, N_pad, F_p, F2_p, H_p)
    B_pad = _round_up(B, TB)

    # ---- glue: channels-last, edge-pad points, zero-pad batch rows -------- #
    x = jnp.transpose(state, (0, 2, 1)).astype(jnp.float32)      # (B, N, 3)
    if N_pad != N:
        # edge-replicate points: identical conv outputs, so the max is unchanged
        x = jnp.pad(x, ((0, 0), (0, N_pad - N), (0, 0)), mode="edge")
    if B_pad != B:
        x = jnp.pad(x, ((0, B_pad - B), (0, 0), (0, 0)))
    x2d = x.reshape(B_pad * N_pad, 3).astype(conv_dtype)

    def pad2(a, rows, cols):
        return jnp.pad(a, ((0, rows - a.shape[0]), (0, cols - a.shape[1])))

    w1 = pad2(params["w1"], 3, F_p).astype(conv_dtype)
    w2 = pad2(params["w2"], F_p, F2_p).astype(conv_dtype)
    w3 = pad2(params["w3"], F2_p, H_p).astype(conv_dtype)
    w4 = pad2(params["w4"], H_p, H_p).astype(conv_dtype)
    w5 = pad2(params["w5"], H_p, H_p).astype(conv_dtype)
    b1 = pad2(params["b1"], 1, F_p)
    b2 = pad2(params["b2"], 1, F2_p)
    b3 = pad2(params["b3"], 1, H_p)
    b4 = pad2(params["b4"], 1, H_p)
    b5 = pad2(params["b5"], 1, H_p)

    def const_spec(shape):
        # constant index_map: weights/biases are fetched once, never re-tiled
        return pl.BlockSpec(shape, lambda i, _nd=len(shape): (0,) * _nd)

    # ---- stage 1: per-point conv stack + max pool over points ------------- #
    pooled = pl.pallas_call(
        functools.partial(_conv_pool_kernel, tb=TB, n_pad=N_pad),
        out_shape=jax.ShapeDtypeStruct((B_pad, H_p), jnp.float32),
        grid_spec=pltpu.PrefetchScalarGridSpec(
            num_scalar_prefetch=0,
            grid=(B_pad // TB,),
            in_specs=[
                pl.BlockSpec((TB * N_pad, 3), lambda i: (i, 0)),
                const_spec((3, F_p)), const_spec((1, F_p)),
                const_spec((F_p, F2_p)), const_spec((1, F2_p)),
                const_spec((F2_p, H_p)), const_spec((1, H_p)),
            ],
            out_specs=pl.BlockSpec((TB, H_p), lambda i: (i, 0)),
        ),
        compiler_params=pltpu.CompilerParams(
            dimension_semantics=("parallel",),
            vmem_limit_bytes=48 * 1024 * 1024,
        ),
    )(x2d, w1, b1, w2, b2, w3, b3)

    # ---- stage 2: MLP head, batched over the whole (padded) batch ---------- #
    if B_pad <= 128:
        TBH, B_head = B_pad, B_pad
    else:
        TBH = 128
        B_head = _round_up(B_pad, TBH)
        pooled = jnp.pad(pooled, ((0, B_head - B_pad), (0, 0)))

    head = pl.pallas_call(
        _mlp_head_kernel,
        out_shape=jax.ShapeDtypeStruct((B_head, H_p), jnp.float32),
        grid_spec=pltpu.PrefetchScalarGridSpec(
            num_scalar_prefetch=0,
            grid=(B_head // TBH,),
            in_specs=[
                pl.BlockSpec((TBH, H_p), lambda i: (i, 0)),
                const_spec((H_p, H_p)), const_spec((1, H_p)),
                const_spec((H_p, H_p)), const_spec((1, H_p)),
            ],
            out_specs=pl.BlockSpec((TBH, H_p), lambda i: (i, 0)),
        ),
        compiler_params=pltpu.CompilerParams(
            dimension_semantics=("parallel",)),
    )(pooled, w4, b4, w5, b5)

    return head[:B, :H]


# ------------------------- params / reference ------------------------------ #

def init_params(key, num_filters, hid_size):
    """Deterministic synthetic init. Weights stored as (in, out); biases (1, out)."""
    ks = jax.random.split(key, 10)
    F, H = num_filters, hid_size

    def w(k, shape):
        return jax.random.normal(k, shape, jnp.float32) * 0.1

    return {
        "w1": w(ks[0], (3, F)),       "b1": w(ks[1], (1, F)),
        "w2": w(ks[2], (F, 2 * F)),   "b2": w(ks[3], (1, 2 * F)),
        "w3": w(ks[4], (2 * F, H)),   "b3": w(ks[5], (1, H)),
        "w4": w(ks[6], (H, H)),       "b4": w(ks[7], (1, H)),
        "w5": w(ks[8], (H, H)),       "b5": w(ks[9], (1, H)),
    }


def _reference(state, params):
    """Pure-JAX reference mirroring the PyTorch forward."""
    x = jnp.transpose(state, (0, 2, 1))                       # (B, N, 3)
    h = jax.nn.relu(x @ params["w1"] + params["b1"])
    h = jax.nn.relu(h @ params["w2"] + params["b2"])
    h = jax.nn.relu(h @ params["w3"] + params["b3"])
    g = jnp.max(h, axis=1)                                    # (B, H)
    g = jax.nn.relu(g @ params["w4"] + params["b4"])
    g = jax.nn.relu(g @ params["w5"] + params["b5"])
    return g


if __name__ == "__main__":
    key = jax.random.PRNGKey(0)
    k_x, k_p = jax.random.split(key)

    B, N = 2, 16            # batch, num points
    num_filters, hid_size = 8, 32

    state = jax.random.normal(k_x, (B, 3, N), jnp.float32)    # PyTorch NCL layout
    params = init_params(k_p, num_filters, hid_size)

    out = point_cloud_encoder(state, params)
    out = jax.block_until_ready(out)

    ref = _reference(state, params)
    assert out.shape == (B, hid_size)
    assert jnp.allclose(out, ref, atol=1e-5, rtol=1e-5), "mismatch vs reference"

    print("KERNEL_OK")
</pallas_src>

<mosaic_0001>
module attributes {stable_mosaic.version = 11 : i64} {
  func.func @_conv_pool_kernel(%arg0: i32, %arg1: memref<128x3xf32, #tpu.memory_space<vmem>>, %arg2: memref<3x128xf32, #tpu.memory_space<vmem>>, %arg3: memref<1x128xf32, #tpu.memory_space<vmem>>, %arg4: memref<128x128xf32, #tpu.memory_space<vmem>>, %arg5: memref<1x128xf32, #tpu.memory_space<vmem>>, %arg6: memref<128x128xf32, #tpu.memory_space<vmem>>, %arg7: memref<1x128xf32, #tpu.memory_space<vmem>>, %arg8: memref<8x128xf32, #tpu.memory_space<vmem>>) attributes {dimension_semantics = [#tpu.dimension_semantics<parallel>], iteration_bounds = array<i64: 1>, scalar_prefetch = 0 : i64, scratch_operands = 0 : i64, tpu.core_type = #tpu.core_type<tc>, window_params = [{transform_indices = @transform_0, window_bounds = array<i64: 128, 3>}, {pipeline_mode = #tpu.pipeline_mode<synchronous>, transform_indices = @transform_1, window_bounds = array<i64: 3, 128>}, {pipeline_mode = #tpu.pipeline_mode<synchronous>, transform_indices = @transform_2, window_bounds = array<i64: 1, 128>}, {pipeline_mode = #tpu.pipeline_mode<synchronous>, transform_indices = @transform_3, window_bounds = array<i64: 128, 128>}, {pipeline_mode = #tpu.pipeline_mode<synchronous>, transform_indices = @transform_4, window_bounds = array<i64: 1, 128>}, {pipeline_mode = #tpu.pipeline_mode<synchronous>, transform_indices = @transform_5, window_bounds = array<i64: 128, 128>}, {pipeline_mode = #tpu.pipeline_mode<synchronous>, transform_indices = @transform_6, window_bounds = array<i64: 1, 128>}, {transform_indices = @transform_7, window_bounds = array<i64: 8, 128>}]} {
    %c0 = arith.constant 0 : index
    %c0_0 = arith.constant 0 : index
    %0 = vector.load %arg1[%c0, %c0_0] : memref<128x3xf32, #tpu.memory_space<vmem>>, vector<128x3xf32>
    %c0_1 = arith.constant 0 : index
    %c0_2 = arith.constant 0 : index
    %1 = vector.load %arg2[%c0_1, %c0_2] : memref<3x128xf32, #tpu.memory_space<vmem>>, vector<3x128xf32>
    %cst = arith.constant dense<0.000000e+00> : vector<128x128xf32>
    %2 = tpu.matmul %0, %1, %cst {dimension_numbers = #tpu.dot_dimension_numbers<[1], [0], [0], [1], [0, 0, 1, 1], [], []>} : vector<128x3xf32>, vector<3x128xf32>, vector<128x128xf32> -> vector<128x128xf32>
    %c0_3 = arith.constant 0 : index
    %c0_4 = arith.constant 0 : index
    %3 = vector.load %arg3[%c0_3, %c0_4] : memref<1x128xf32, #tpu.memory_space<vmem>>, vector<1x128xf32>
    %4 = vector.broadcast %3 : vector<1x128xf32> to vector<128x128xf32>
    %5 = arith.addf %2, %4 : vector<128x128xf32>
    %cst_5 = arith.constant 0.000000e+00 : f32
    %6 = vector.broadcast %cst_5 : f32 to vector<128x128xf32>
    %7 = arith.maximumf %5, %6 : vector<128x128xf32>
    %c0_6 = arith.constant 0 : index
    %c0_7 = arith.constant 0 : index
    %8 = vector.load %arg4[%c0_6, %c0_7] : memref<128x128xf32, #tpu.memory_space<vmem>>, vector<128x128xf32>
    %cst_8 = arith.constant dense<0.000000e+00> : vector<128x128xf32>
    %9 = tpu.matmul %7, %8, %cst_8 {dimension_numbers = #tpu.dot_dimension_numbers<[1], [0], [0], [1], [0, 0, 1, 1], [], []>} : vector<128x128xf32>, vector<128x128xf32>, vector<128x128xf32> -> vector<128x128xf32>
    %c0_9 = arith.constant 0 : index
    %c0_10 = arith.constant 0 : index
    %10 = vector.load %arg5[%c0_9, %c0_10] : memref<1x128xf32, #tpu.memory_space<vmem>>, vector<1x128xf32>
    %11 = vector.broadcast %10 : vector<1x128xf32> to vector<128x128xf32>
    %12 = arith.addf %9, %11 : vector<128x128xf32>
    %cst_11 = arith.constant 0.000000e+00 : f32
    %13 = vector.broadcast %cst_11 : f32 to vector<128x128xf32>
    %14 = arith.maximumf %12, %13 : vector<128x128xf32>
    %c0_12 = arith.constant 0 : index
    %c0_13 = arith.constant 0 : index
    %15 = vector.load %arg6[%c0_12, %c0_13] : memref<128x128xf32, #tpu.memory_space<vmem>>, vector<128x128xf32>
    %cst_14 = arith.constant dense<0.000000e+00> : vector<128x128xf32>
    %16 = tpu.matmul %14, %15, %cst_14 {dimension_numbers = #tpu.dot_dimension_numbers<[1], [0], [0], [1], [0, 0, 1, 1], [], []>} : vector<128x128xf32>, vector<128x128xf32>, vector<128x128xf32> -> vector<128x128xf32>
    %c0_15 = arith.constant 0 : index
    %c0_16 = arith.constant 0 : index
    %17 = vector.load %arg7[%c0_15, %c0_16] : memref<1x128xf32, #tpu.memory_space<vmem>>, vector<1x128xf32>
    %18 = vector.broadcast %17 : vector<1x128xf32> to vector<128x128xf32>
    %19 = arith.addf %16, %18 : vector<128x128xf32>
    %cst_17 = arith.constant 0.000000e+00 : f32
    %20 = vector.broadcast %cst_17 : f32 to vector<128x128xf32>
    %21 = arith.maximumf %19, %20 : vector<128x128xf32>
    %22 = vector.extract_strided_slice %21 {offsets = [0, 0], sizes = [16, 128], strides = [1, 1]} : vector<128x128xf32> to vector<16x128xf32>
    %cst_18 = arith.constant dense<0xFF800000> : vector<128xf32>
    %23 = vector.multi_reduction <maximumf>, %22, %cst_18 [0] : vector<16x128xf32> to vector<128xf32>
    %24 = vector.shape_cast %23 : vector<128xf32> to vector<1x128xf32>
    %25 = vector.extract_strided_slice %21 {offsets = [16, 0], sizes = [16, 128], strides = [1, 1]} : vector<128x128xf32> to vector<16x128xf32>
    %cst_19 = arith.constant dense<0xFF800000> : vector<128xf32>
    %26 = vector.multi_reduction <maximumf>, %25, %cst_19 [0] : vector<16x128xf32> to vector<128xf32>
    %27 = vector.shape_cast %26 : vector<128xf32> to vector<1x128xf32>
    %28 = vector.extract_strided_slice %21 {offsets = [32, 0], sizes = [16, 128], strides = [1, 1]} : vector<128x128xf32> to vector<16x128xf32>
    %cst_20 = arith.constant dense<0xFF800000> : vector<128xf32>
    %29 = vector.multi_reduction <maximumf>, %28, %cst_20 [0] : vector<16x128xf32> to vector<128xf32>
    %30 = vector.shape_cast %29 : vector<128xf32> to vector<1x128xf32>
    %31 = vector.extract_strided_slice %21 {offsets = [48, 0], sizes = [16, 128], strides = [1, 1]} : vector<128x128xf32> to vector<16x128xf32>
    %cst_21 = arith.constant dense<0xFF800000> : vector<128xf32>
    %32 = vector.multi_reduction <maximumf>, %31, %cst_21 [0] : vector<16x128xf32> to vector<128xf32>
    %33 = vector.shape_cast %32 : vector<128xf32> to vector<1x128xf32>
    %34 = vector.extract_strided_slice %21 {offsets = [64, 0], sizes = [16, 128], strides = [1, 1]} : vector<128x128xf32> to vector<16x128xf32>
    %cst_22 = arith.constant dense<0xFF800000> : vector<128xf32>
    %35 = vector.multi_reduction <maximumf>, %34, %cst_22 [0] : vector<16x128xf32> to vector<128xf32>
    %36 = vector.shape_cast %35 : vector<128xf32> to vector<1x128xf32>
    %37 = vector.extract_strided_slice %21 {offsets = [80, 0], sizes = [16, 128], strides = [1, 1]} : vector<128x128xf32> to vector<16x128xf32>
    %cst_23 = arith.constant dense<0xFF800000> : vector<128xf32>
    %38 = vector.multi_reduction <maximumf>, %37, %cst_23 [0] : vector<16x128xf32> to vector<128xf32>
    %39 = vector.shape_cast %38 : vector<128xf32> to vector<1x128xf32>
    %40 = vector.extract_strided_slice %21 {offsets = [96, 0], sizes = [16, 128], strides = [1, 1]} : vector<128x128xf32> to vector<16x128xf32>
    %cst_24 = arith.constant dense<0xFF800000> : vector<128xf32>
    %41 = vector.multi_reduction <maximumf>, %40, %cst_24 [0] : vector<16x128xf32> to vector<128xf32>
    %42 = vector.shape_cast %41 : vector<128xf32> to vector<1x128xf32>
    %43 = vector.extract_strided_slice %21 {offsets = [112, 0], sizes = [16, 128], strides = [1, 1]} : vector<128x128xf32> to vector<16x128xf32>
    %cst_25 = arith.constant dense<0xFF800000> : vector<128xf32>
    %44 = vector.multi_reduction <maximumf>, %43, %cst_25 [0] : vector<16x128xf32> to vector<128xf32>
    %45 = vector.shape_cast %44 : vector<128xf32> to vector<1x128xf32>
    %46 = tpu.concatenate %24, %27, %30, %33, %36, %39, %42, %45 in 0 : vector<1x128xf32>, vector<1x128xf32>, vector<1x128xf32>, vector<1x128xf32>, vector<1x128xf32>, vector<1x128xf32>, vector<1x128xf32>, vector<1x128xf32> -> vector<8x128xf32>
    %c0_26 = arith.constant 0 : index
    %c0_27 = arith.constant 0 : index
    %47 = vector.load %arg8[%c0_26, %c0_27] : memref<8x128xf32, #tpu.memory_space<vmem>>, vector<8x128xf32>
    tpu.vector_store %arg8[%c0_26, %c0_27], %46 {strides = array<i32>} : memref<8x128xf32, #tpu.memory_space<vmem>>, vector<8x128xf32>,
    return
  }
  func.func @transform_0(%arg0: i32) -> (i32, i32) {
    %c0_i32 = arith.constant 0 : i32
    %c0_i32_0 = arith.constant 0 : i32
    return %arg0, %c0_i32 : i32, i32
  }
  func.func @transform_1(%arg0: i32) -> (i32, i32) {
    %c0_i32 = arith.constant 0 : i32
    %c0_i32_0 = arith.constant 0 : i32
    %c0_i32_1 = arith.constant 0 : i32
    return %c0_i32, %c0_i32_0 : i32, i32
  }
  func.func @transform_2(%arg0: i32) -> (i32, i32) {
    %c0_i32 = arith.constant 0 : i32
    %c0_i32_0 = arith.constant 0 : i32
    %c0_i32_1 = arith.constant 0 : i32
    return %c0_i32, %c0_i32_0 : i32, i32
  }
  func.func @transform_3(%arg0: i32) -> (i32, i32) {
    %c0_i32 = arith.constant 0 : i32
    %c0_i32_0 = arith.constant 0 : i32
    %c0_i32_1 = arith.constant 0 : i32
    return %c0_i32, %c0_i32_0 : i32, i32
  }
  func.func @transform_4(%arg0: i32) -> (i32, i32) {
    %c0_i32 = arith.constant 0 : i32
    %c0_i32_0 = arith.constant 0 : i32
    %c0_i32_1 = arith.constant 0 : i32
    return %c0_i32, %c0_i32_0 : i32, i32
  }
  func.func @transform_5(%arg0: i32) -> (i32, i32) {
    %c0_i32 = arith.constant 0 : i32
    %c0_i32_0 = arith.constant 0 : i32
    %c0_i32_1 = arith.constant 0 : i32
    return %c0_i32, %c0_i32_0 : i32, i32
  }
  func.func @transform_6(%arg0: i32) -> (i32, i32) {
    %c0_i32 = arith.constant 0 : i32
    %c0_i32_0 = arith.constant 0 : i32
    %c0_i32_1 = arith.constant 0 : i32
    return %c0_i32, %c0_i32_0 : i32, i32
  }
  func.func @transform_7(%arg0: i32) -> (i32, i32) {
    %c0_i32 = arith.constant 0 : i32
    %c0_i32_0 = arith.constant 0 : i32
    return %arg0, %c0_i32 : i32, i32
  }
}

</mosaic_0001>

<bundles_post_ra>
// kernel: tpu_custom_call.1
= control target key start
LH: loop header
LB: loop body
LE: loop exit
PB: predicated region body
PF: predicated region fallthrough
CT: control target
= control target key end

     0   :  { %12 = vsyncpa [#allocation3], 0  ;;  %s1214_s0 = inlined_call_operand.vmem [shape: f32[128,3], index: 0, kind: input, shape index: {}]   ;;  %s1215_s1 = inlined_call_operand.vmem [shape: f32[3,128], index: 1, kind: input, shape index: {}]   ;;  %s1216_s2 = inlined_call_operand.vmem [shape: f32[1,128], index: 2, kind: input, shape index: {}]   ;;  %s1217_s3 = inlined_call_operand.vmem [shape: f32[128,128], index: 3, kind: input, shape index: {}]   ;;  %s1218_s4 = inlined_call_operand.vmem [shape: f32[1,128], index: 4, kind: input, shape index: {}]   ;;  %s1219_s5 = inlined_call_operand.hbm [shape: f32[128,128], index: 5, kind: input, shape index: {}]   ;;  %s1220_s6 = inlined_call_operand.vmem [shape: f32[1,128], index: 6, kind: input, shape index: {}]   ;;  %s1221_s7 = inlined_call_operand.hbm [shape: f32[8,128], index: 7, kind: output, shape index: {}]  }
   0x1   :  { %13 = vsyncpa [#allocation4], 0  ;;  %s1019_s24 = smov [#allocation2]  }
   0x2   :  { %s29_s25 = sshll.u32 %s1019_s24, 4  ;;  %s30_s25 = int_to_ptr.vmem [resolvable:$true] %s29_s25 }
   0x3   :  { %s983_s26 = scalar_lea.vmem %s30_s25, 2048  ;;  %p988_p1 = scmp.lt.s32.totalorder %s30_s25, %s30_s25 }
   0x4   :  { %p984_p0 = scmp.ne.s32.totalorder %s30_s25, %s983_s26  ;;  %p989_p2 = scmp.lt.s32.totalorder %s983_s26, %s983_s26 }
   0x6   :  { %p990_p3 = por %p989_p2, %p988_p1 }
   0x8   :  { %p991_p4 = pnand %p990_p3, %p984_p0 }
   0xa   :  { %994 = shalt.err (!%p991_p4)
}
   0xb   :  { %s1020_s27 = smov 128   ;;  %s1021_s28 = smov 8  }
   0xc   :  { %35 = dma.hbm_to_vmem [thread:$0]  %s1219_s5, 2048, %s30_s25, [#allocation3], %s1020_s27, %s1020_s27, %s1021_s28  }
   0xd   :  { %1015 = dma.done.wait [#allocation3], 2048  }
   0xe   :  { %1016 = vsyncadd [#allocation3], 4294965248  ;;  %vm114_vm0 = vcmask 1042432   ;;  %vm65_vm1 = vcmask 23552   ;;  %v57_v0 = vld [vmem:[%s1215_s1] sm:$0x7] }
   0xf   :  { %v41_v1 = vld [vmem:[%s1214_s0] sm:$0xff]  ;;  %v42_v2 = vld [vmem:[%s1214_s0 + $0x8] sm:$0xff]  ;;  %833 = vmatprep.subr.msk.mxu0 %vm114_vm0, %v57_v0  ;;  %v43_v3 = vld [vmem:[%s1214_s0 + $0x10] sm:$0xff]  ;;  %vm703_vm2 = vcmask 1040384   ;;  %vm705_vm3 = vcmask 1041408   ;;  %vm708_vm4 = vcmask 1043456  }
  0x10   :  { %835 = vmatprep.mubr.msk.f32.mxu0 %vm65_vm1, %v41_v1  ;;  %834 = vmatpush3.msk.msra.mxu0 %vm114_vm0, %v57_v0  ;;  %v44_v4 = vld [vmem:[%s1214_s0 + $0x18] sm:$0xff]  ;;  %v45_v5 = vld [vmem:[%s1214_s0 + $0x20] sm:$0xff]  ;;  %v293_v7 = vld [vmem:[%s1217_s3 + $0x70] sm:$0xff]  ;;  %vm710_vm5 = vcmask 1044480   ;;  %vm712_vm6 = vcmask 1045504   ;;  %vm714_vm7 = vcmask 1046528  }
  0x11   :  { %836 = vmatmul.mubr.msk.f32.vlgmr.msra.gmra.mxu0 %vm65_vm1, %v42_v2  ;;  %v294_v6 = vld [vmem:[%s1217_s3 + $0x78] sm:$0xff]  ;;  %v292_v8 = vld [vmem:[%s1217_s3 + $0x68] sm:$0xff]  ;;  %v47_v10 = vld [vmem:[%s1214_s0 + $0x30] sm:$0xff] }
  0x12   :  { %838 = vmatprep.mubr.msk.f32.mxu0 %vm65_vm1, %v43_v3  ;;  %859 = vmatprep.subr.mxu1 %v294_v6  ;;  %v46_v9 = vld [vmem:[%s1214_s0 + $0x28] sm:$0xff]  ;;  %v291_v11 = vld [vmem:[%s1217_s3 + $0x60] sm:$0xff]  ;;  %v290_v12 = vld [vmem:[%s1217_s3 + $0x58] sm:$0xff] }
  0x13   :  { %860 = vmatpush3.msra.mxu1 %v294_v6  ;;  %v48_v13 = vld [vmem:[%s1214_s0 + $0x38] sm:$0xff]  ;;  %v49_v14 = vld [vmem:[%s1214_s0 + $0x40] sm:$0xff]  ;;  %v289_v15 = vld [vmem:[%s1217_s3 + $0x50] sm:$0xff] }
  0x14   :  { %861 = vmatprep.subr.mxu1 %v293_v7  ;;  %v288_v16 = vld [vmem:[%s1217_s3 + $0x48] sm:$0xff]  ;;  %v51_v18 = vld [vmem:[%s1214_s0 + $0x50] sm:$0xff]  ;;  %v287_v19 = vld [vmem:[%s1217_s3 + $0x40] sm:$0xff] }
  0x15   :  { %839 = vmatmul.mubr.msk.f32.gmra.mxu0 %vm65_vm1, %v44_v4  ;;  %862 = vmatpush3.msra.mxu1 %v293_v7  ;;  %v50_v17 = vld [vmem:[%s1214_s0 + $0x48] sm:$0xff]  ;;  %v286_v20 = vld [vmem:[%s1217_s3 + $0x38] sm:$0xff]  ;;  %v53_v22 = vld [vmem:[%s1214_s0 + $0x60] sm:$0xff] }
  0x16   :  { %841 = vmatprep.mubr.msk.f32.mxu0 %vm65_vm1, %v45_v5  ;;  %863 = vmatprep.subr.mxu1 %v292_v8  ;;  %v52_v21 = vld [vmem:[%s1214_s0 + $0x58] sm:$0xff]  ;;  %v285_v23 = vld [vmem:[%s1217_s3 + $0x30] sm:$0xff]  ;;  %v284_v24 = vld [vmem:[%s1217_s3 + $0x28] sm:$0xff] }
  0x17   :  { %864 = vmatpush3.msra.mxu1 %v292_v8  ;;  %v54_v25 = vld [vmem:[%s1214_s0 + $0x68] sm:$0xff]  ;;  %v55_v26 = vld [vmem:[%s1214_s0 + $0x70] sm:$0xff]  ;;  %v283_v27 = vld [vmem:[%s1217_s3 + $0x20] sm:$0xff] }
  0x18   :  { %865 = vmatprep.subr.mxu1 %v291_v11  ;;  %v56_v28 = vld [vmem:[%s1214_s0 + $0x78] sm:$0xff]  ;;  %v281_v30 = vld [vmem:[%s1217_s3 + $0x10] sm:$0xff]  ;;  %v280_v31 = vld [vmem:[%s1217_s3 + $0x8] sm:$0xff] }
  0x19   :  { %842 = vmatmul.mubr.msk.f32.gmra.mxu0 %vm65_vm1, %v46_v9  ;;  %866 = vmatpush3.msra.mxu1 %v291_v11  ;;  %v282_v29 = vld [vmem:[%s1217_s3 + $0x18] sm:$0xff]  ;;  %v279_v32 = vld [vmem:[%s1217_s3] sm:$0xff]  ;;  %v477_v34 = vld [vmem:[#allocation2 + $0x70] sm:$0xff] }
  0x1a   :  { %844 = vmatprep.mubr.msk.f32.mxu0 %vm65_vm1, %v47_v10  ;;  %867 = vmatprep.subr.mxu1 %v290_v12  ;;  %v478_v33 = vld [vmem:[#allocation2 + $0x78] sm:$0xff]  ;;  %v476_v35 = vld [vmem:[#allocation2 + $0x68] sm:$0xff]  ;;  %v475_v36 = vld [vmem:[#allocation2 + $0x60] sm:$0xff] }
  0x1b   :  { %868 = vmatpush3.msra.mxu1 %v290_v12  ;;  %915 = vmatprep.subr.mxu0 %v478_v33  ;;  %v474_v37 = vld [vmem:[#allocation2 + $0x58] sm:$0xff]  ;;  %v473_v38 = vld [vmem:[#allocation2 + $0x50] sm:$0xff]  ;;  %v472_v39 = vld [vmem:[#allocation2 + $0x48] sm:$0xff] }
  0x1c   :  { %869 = vmatprep.subr.mxu1 %v289_v15  ;;  %916 = vmatpush3.msra.mxu0 %v478_v33  ;;  %v471_v40 = vld [vmem:[#allocation2 + $0x40] sm:$0xff]  ;;  %v470_v41 = vld [vmem:[#allocation2 + $0x38] sm:$0xff]  ;;  %v469_v42 = vld [vmem:[#allocation2 + $0x30] sm:$0xff] }
  0x1d   :  { %845 = vmatmul.mubr.msk.f32.gmra.mxu0 %vm65_vm1, %v48_v13  ;;  %870 = vmatpush3.msra.mxu1 %v289_v15  ;;  %v468_v43 = vld [vmem:[#allocation2 + $0x28] sm:$0xff]  ;;  %v467_v44 = vld [vmem:[#allocation2 + $0x20] sm:$0xff]  ;;  %v466_v45 = vld [vmem:[#allocation2 + $0x18] sm:$0xff] }
  0x1e   :  { %847 = vmatprep.mubr.msk.f32.mxu0 %vm65_vm1, %v49_v14  ;;  %871 = vmatprep.subr.mxu1 %v288_v16  ;;  %v732_v46 = vld [vmem:[%s1216_s2] ss:$0 sm:$0xff] }
  0x1f   :  { %872 = vmatpush3.msra.mxu1 %v288_v16  ;;  %917 = vmatprep.subr.mxu0 %v477_v34  ;;  %v463_v33 = vld [vmem:[#allocation2] sm:$0xff] }
  0x20   :  { %873 = vmatprep.subr.mxu1 %v287_v19  ;;  %918 = vmatpush3.msra.mxu0 %v477_v34  ;;  %v750_v34 = vld [vmem:[%s1218_s4] ss:$0 sm:$0xff] }
  0x21   :  { %848 = vmatmul.mubr.msk.f32.gmra.mxu0 %vm65_vm1, %v50_v17  ;;  %874 = vmatpush3.msra.mxu1 %v287_v19 }
  0x22   :  { %850 = vmatprep.mubr.msk.f32.mxu0 %vm65_vm1, %v51_v18  ;;  %875 = vmatprep.subr.mxu1 %v286_v20 }
  0x23   :  { %876 = vmatpush3.msra.mxu1 %v286_v20  ;;  %919 = vmatprep.subr.mxu0 %v476_v35 }
  0x24   :  { %877 = vmatprep.subr.mxu1 %v285_v23  ;;  %920 = vmatpush3.msra.mxu0 %v476_v35 }
  0x25   :  { %851 = vmatmul.mubr.msk.f32.gmra.mxu0 %vm65_vm1, %v52_v21  ;;  %878 = vmatpush3.msra.mxu1 %v285_v23 }
  0x26   :  { %853 = vmatprep.mubr.msk.f32.mxu0 %vm65_vm1, %v53_v22  ;;  %879 = vmatprep.subr.mxu1 %v284_v24 }
  0x27   :  { %880 = vmatpush3.msra.mxu1 %v284_v24  ;;  %921 = vmatprep.subr.mxu0 %v475_v36 }
  0x28   :  { %881 = vmatprep.subr.mxu1 %v283_v27  ;;  %922 = vmatpush3.msra.mxu0 %v475_v36 }
  0x29   :  { %854 = vmatmul.mubr.msk.f32.gmra.mxu0 %vm65_vm1, %v54_v25  ;;  %882 = vmatpush3.msra.mxu1 %v283_v27 }
  0x2a   :  { %856 = vmatprep.mubr.msk.f32.mxu0 %vm65_vm1, %v55_v26  ;;  %883 = vmatprep.subr.mxu1 %v282_v29 }
  0x2b   :  { %884 = vmatpush3.msra.mxu1 %v282_v29  ;;  %923 = vmatprep.subr.mxu0 %v474_v37 }
  0x2c   :  { %885 = vmatprep.subr.mxu1 %v281_v30  ;;  %924 = vmatpush3.msra.mxu0 %v474_v37 }
  0x2d   :  { %857 = vmatmul.mubr.msk.f32.gmra.mxu0 %vm65_vm1, %v56_v28  ;;  %886 = vmatpush3.msra.mxu1 %v281_v30 }
  0x2e   :  { %887 = vmatprep.subr.mxu1 %v280_v31  ;;  %925 = vmatprep.subr.mxu0 %v473_v38 }
  0x2f   :  { %888 = vmatpush3.msra.mxu1 %v280_v31  ;;  %926 = vmatpush3.msra.mxu0 %v473_v38  ;;  %v465_v31 = vld [vmem:[#allocation2 + $0x10] sm:$0xff] }
  0x30   :  { %889 = vmatprep.subr.mxu1 %v279_v32  ;;  %927 = vmatprep.subr.mxu0 %v472_v39 }
  0x31   :  { %890 = vmatpush3.msra.mxu1 %v279_v32  ;;  %928 = vmatpush3.msra.mxu0 %v472_v39  ;;  %v464_v32 = vld [vmem:[#allocation2 + $0x8] sm:$0xff] }
  0x32   :  { %929 = vmatprep.subr.mxu0 %v471_v40 }
  0x33   :  { %930 = vmatpush3.msra.mxu0 %v471_v40 }
  0x34   :  { %931 = vmatprep.subr.mxu0 %v470_v41 }
  0x35   :  { %932 = vmatpush3.msra.mxu0 %v470_v41 }
  0x36   :  { %933 = vmatprep.subr.mxu0 %v469_v42 }
  0x37   :  { %934 = vmatpush3.msra.mxu0 %v469_v42 }
  0x38   :  { %935 = vmatprep.subr.mxu0 %v468_v43 }
  0x39   :  { %936 = vmatpush3.msra.mxu0 %v468_v43 }
  0x3a   :  { %937 = vmatprep.subr.mxu0 %v467_v44 }
  0x3b   :  { %938 = vmatpush3.msra.mxu0 %v467_v44 }
  0x3c   :  { %939 = vmatprep.subr.mxu0 %v466_v45 }
  0x3d   :  { %940 = vmatpush3.msra.mxu0 %v466_v45 }
  0x3e   :  { %941 = vmatprep.subr.mxu0 %v465_v31 }
  0x3f   :  { %942 = vmatpush3.msra.mxu0 %v465_v31 }
  0x40   :  { %943 = vmatprep.subr.mxu0 %v464_v32 }
  0x41   :  { %944 = vmatpush3.msra.mxu0 %v464_v32 }
  0x42   :  { %945 = vmatprep.subr.mxu0 %v463_v33 }
  0x43   :  { %946 = vmatpush3.msra.mxu0 %v463_v33 }
  0xd1   :  { %v837_v47 = vpop.f32.mrf.mxu0 }
  0xd2   :  { %v190_v48 = vadd.f32 %v837_v47, %v732_v46 }
  0xd3   :  { %v184_v49 = vpop.f32.mrf.mxu0 }
  0xd4   :  { %v185_v50 = vadd.f32 %v732_v46, %v184_v49  ;;  %v264_v53 = vmax.f32 %v190_v48, 0.0 }
  0xd5   :  { %v840_v51 = vpop.f32.mrf.mxu0 }
  0xd6   :  { %v263_v52 = vmax.f32 %v185_v50, 0.0  ;;  %v200_v54 = vadd.f32 %v840_v51, %v732_v46 }
  0xd7   :  { %v194_v55 = vpop.f32.mrf.mxu0 }
  0xd8   :  { %v195_v56 = vadd.f32 %v732_v46, %v194_v55  ;;  %891 = vmatprep.mubr.f32.mxu1 %v263_v52  ;;  %v266_v59 = vmax.f32 %v200_v54, 0.0 }
  0xd9   :  { %v843_v57 = vpop.f32.mrf.mxu0  ;;  %892 = vmatmul.mubr.f32.vlgmr.msra.gmra.mxu1 %v264_v53 }
  0xda   :  { %v265_v58 = vmax.f32 %v195_v56, 0.0  ;;  %v210_v60 = vadd.f32 %v843_v57, %v732_v46 }
  0xdb   :  { %v204_v61 = vpop.f32.mrf.mxu0 }
  0xdc   :  { %v205_v62 = vadd.f32 %v732_v46, %v204_v61  ;;  %894 = vmatprep.mubr.f32.mxu1 %v265_v58  ;;  %v268_v1 = vmax.f32 %v210_v60, 0.0 }
  0xdd   :  { %v846_v63 = vpop.f32.mrf.mxu0  ;;  %895 = vmatmul.mubr.f32.gmra.mxu1 %v266_v59 }
  0xde   :  { %v267_v0 = vmax.f32 %v205_v62, 0.0  ;;  %v220_v2 = vadd.f32 %v846_v63, %v732_v46 }
  0xdf   :  { %v214_v3 = vpop.f32.mrf.mxu0 }
  0xe0   :  { %v215_v4 = vadd.f32 %v732_v46, %v214_v3  ;;  %897 = vmatprep.mubr.f32.mxu1 %v267_v0  ;;  %v270_v7 = vmax.f32 %v220_v2, 0.0 }
  0xe1   :  { %v849_v5 = vpop.f32.mrf.mxu0  ;;  %898 = vmatmul.mubr.f32.gmra.mxu1 %v268_v1 }
  0xe2   :  { %v269_v6 = vmax.f32 %v215_v4, 0.0  ;;  %v230_v8 = vadd.f32 %v849_v5, %v732_v46 }
  0xe3   :  { %v224_v9 = vpop.f32.mrf.mxu0 }
  0xe4   :  { %v225_v10 = vadd.f32 %v732_v46, %v224_v9  ;;  %900 = vmatprep.mubr.f32.mxu1 %v269_v6  ;;  %v272_v13 = vmax.f32 %v230_v8, 0.0 }
  0xe5   :  { %v852_v11 = vpop.f32.mrf.mxu0  ;;  %901 = vmatmul.mubr.f32.gmra.mxu1 %v270_v7 }
  0xe6   :  { %v271_v12 = vmax.f32 %v225_v10, 0.0  ;;  %v240_v14 = vadd.f32 %v852_v11, %v732_v46 }
  0xe7   :  { %v234_v15 = vpop.f32.mrf.mxu0 }
  0xe8   :  { %v235_v16 = vadd.f32 %v732_v46, %v234_v15  ;;  %903 = vmatprep.mubr.f32.mxu1 %v271_v12  ;;  %v274_v19 = vmax.f32 %v240_v14, 0.0 }
  0xe9   :  { %v855_v17 = vpop.f32.mrf.mxu0  ;;  %904 = vmatmul.mubr.f32.gmra.mxu1 %v272_v13 }
  0xea   :  { %v273_v18 = vmax.f32 %v235_v16, 0.0  ;;  %v250_v20 = vadd.f32 %v855_v17, %v732_v46 }
  0xeb   :  { %v244_v21 = vpop.f32.mrf.mxu0 }
  0xec   :  { %v245_v22 = vadd.f32 %v732_v46, %v244_v21  ;;  %906 = vmatprep.mubr.f32.mxu1 %v273_v18  ;;  %v276_v25 = vmax.f32 %v250_v20, 0.0 }
  0xed   :  { %v858_v23 = vpop.f32.mrf.mxu0  ;;  %907 = vmatmul.mubr.f32.gmra.mxu1 %v274_v19 }
  0xee   :  { %v275_v24 = vmax.f32 %v245_v22, 0.0  ;;  %v260_v26 = vadd.f32 %v858_v23, %v732_v46  ;;  %v1192_v22 = vld [vmem:[%s1220_s6] ss:$0 sm:$0xff]  ;;  %s1022_s6 = smov [#allocation5]  }
  0xef   :  { %v254_v27 = vpop.f32.mrf.mxu0  ;;  %s723_s24 = sshll.u32 %s1022_s6, 4  ;;  %s724_s24 = int_to_ptr.vmem [resolvable:$true] %s723_s24 }
  0xf0   :  { %v255_v28 = vadd.f32 %v732_v46, %v254_v27  ;;  %909 = vmatprep.mubr.f32.mxu1 %v275_v24  ;;  %v278_v30 = vmax.f32 %v260_v26, 0.0  ;;  %s995_s25 = scalar_lea.vmem %s724_s24, 128  ;;  %p1000_p6 = scmp.lt.s32.totalorder %s724_s24, %s724_s24 }
  0xf1   :  { %910 = vmatmul.mubr.f32.gmra.mxu1 %v276_v25  ;;  %p996_p5 = scmp.ne.s32.totalorder %s724_s24, %s995_s25  ;;  %p1001_p7 = scmp.lt.s32.totalorder %s995_s25, %s995_s25 }
  0xf2   :  { %v277_v29 = vmax.f32 %v255_v28, 0.0 }
  0xf3   :  { %p1002_p8 = por %p1001_p7, %p1000_p6 }
  0xf4   :  { %912 = vmatprep.mubr.f32.mxu1 %v277_v29 }
  0xf5   :  { %913 = vmatmul.mubr.f32.gmra.mxu1 %v278_v30  ;;  %p1003_p9 = pnand %p1002_p8, %p996_p5 }
 0x199   :  { %v893_v35 = vpop.f32.mrf.mxu1 }
 0x19a   :  { %v374_v36 = vadd.f32 %v893_v35, %v750_v34 }
 0x19b   :  { %v368_v37 = vpop.f32.mrf.mxu1 }
 0x19c   :  { %v369_v38 = vadd.f32 %v750_v34, %v368_v37  ;;  %v448_v41 = vmax.f32 %v374_v36, 0.0 }
 0x19d   :  { %v896_v39 = vpop.f32.mrf.mxu1 }
 0x19e   :  { %v447_v40 = vmax.f32 %v369_v38, 0.0  ;;  %v384_v42 = vadd.f32 %v896_v39, %v750_v34 }
 0x19f   :  { %v378_v43 = vpop.f32.mrf.mxu1 }
 0x1a0   :  { %v379_v44 = vadd.f32 %v750_v34, %v378_v43  ;;  %947 = vmatprep.mubr.f32.mxu0 %v447_v40  ;;  %v450_v47 = vmax.f32 %v384_v42, 0.0 }
 0x1a1   :  { %v899_v45 = vpop.f32.mrf.mxu1  ;;  %948 = vmatmul.mubr.f32.vlgmr.msra.gmra.mxu0 %v448_v41 }
 0x1a2   :  { %v449_v46 = vmax.f32 %v379_v44, 0.0  ;;  %v394_v48 = vadd.f32 %v899_v45, %v750_v34 }
 0x1a3   :  { %v388_v49 = vpop.f32.mrf.mxu1 }
 0x1a4   :  { %v389_v50 = vadd.f32 %v750_v34, %v388_v49  ;;  %950 = vmatprep.mubr.f32.mxu0 %v449_v46  ;;  %v452_v53 = vmax.f32 %v394_v48, 0.0 }
 0x1a5   :  { %v902_v51 = vpop.f32.mrf.mxu1  ;;  %951 = vmatmul.mubr.f32.gmra.mxu0 %v450_v47 }
 0x1a6   :  { %v451_v52 = vmax.f32 %v389_v50, 0.0  ;;  %v404_v54 = vadd.f32 %v902_v51, %v750_v34 }
 0x1a7   :  { %v398_v55 = vpop.f32.mrf.mxu1 }
 0x1a8   :  { %v399_v56 = vadd.f32 %v750_v34, %v398_v55  ;;  %953 = vmatprep.mubr.f32.mxu0 %v451_v52  ;;  %v454_v59 = vmax.f32 %v404_v54, 0.0 }
 0x1a9   :  { %v905_v57 = vpop.f32.mrf.mxu1  ;;  %954 = vmatmul.mubr.f32.gmra.mxu0 %v452_v53 }
 0x1aa   :  { %v453_v58 = vmax.f32 %v399_v56, 0.0  ;;  %v414_v60 = vadd.f32 %v905_v57, %v750_v34 }
 0x1ab   :  { %v408_v61 = vpop.f32.mrf.mxu1 }
 0x1ac   :  { %v409_v62 = vadd.f32 %v750_v34, %v408_v61  ;;  %956 = vmatprep.mubr.f32.mxu0 %v453_v58  ;;  %v456_v1 = vmax.f32 %v414_v60, 0.0 }
 0x1ad   :  { %v908_v63 = vpop.f32.mrf.mxu1  ;;  %957 = vmatmul.mubr.f32.gmra.mxu0 %v454_v59 }
 0x1ae   :  { %v455_v0 = vmax.f32 %v409_v62, 0.0  ;;  %v424_v2 = vadd.f32 %v908_v63, %v750_v34 }
 0x1af   :  { %v418_v3 = vpop.f32.mrf.mxu1 }
 0x1b0   :  { %v419_v4 = vadd.f32 %v750_v34, %v418_v3  ;;  %959 = vmatprep.mubr.f32.mxu0 %v455_v0  ;;  %v458_v7 = vmax.f32 %v424_v2, 0.0 }
 0x1b1   :  { %v911_v5 = vpop.f32.mrf.mxu1  ;;  %960 = vmatmul.mubr.f32.gmra.mxu0 %v456_v1 }
 0x1b2   :  { %v457_v6 = vmax.f32 %v419_v4, 0.0  ;;  %v434_v8 = vadd.f32 %v911_v5, %v750_v34 }
 0x1b3   :  { %v428_v9 = vpop.f32.mrf.mxu1 }
 0x1b4   :  { %v429_v10 = vadd.f32 %v750_v34, %v428_v9  ;;  %962 = vmatprep.mubr.f32.mxu0 %v457_v6  ;;  %v460_v13 = vmax.f32 %v434_v8, 0.0 }
 0x1b5   :  { %v914_v11 = vpop.f32.mrf.mxu1  ;;  %963 = vmatmul.mubr.f32.gmra.mxu0 %v458_v7 }
 0x1b6   :  { %v459_v12 = vmax.f32 %v429_v10, 0.0  ;;  %v444_v14 = vadd.f32 %v914_v11, %v750_v34 }
 0x1b7   :  { %v438_v15 = vpop.f32.mrf.mxu1 }
 0x1b8   :  { %v439_v16 = vadd.f32 %v750_v34, %v438_v15  ;;  %965 = vmatprep.mubr.f32.mxu0 %v459_v12  ;;  %v462_v18 = vmax.f32 %v444_v14, 0.0 }
 0x1b9   :  { %966 = vmatmul.mubr.f32.gmra.mxu0 %v460_v13 }
 0x1ba   :  { %v461_v17 = vmax.f32 %v439_v16, 0.0 }
 0x1bc   :  { %968 = vmatprep.mubr.f32.mxu0 %v461_v17 }
 0x1bd   :  { %969 = vmatmul.mubr.f32.gmra.mxu0 %v462_v18 }
 0x261   :  { %v949_v19 = vpop.f32.mrf.mxu0 }
 0x262   :  { %v558_v28 = vadd.f32 %v949_v19, %v1192_v22 }
 0x263   :  { %v552_v20 = vpop.f32.mrf.mxu0 }
 0x264   :  { %v553_v25 = vadd.f32 %v1192_v22, %v552_v20  ;;  %v632_v37 = vmax.f32 %v558_v28, 0.0 }
 0x265   :  { %v952_v21 = vpop.f32.mrf.mxu0 }
 0x266   :  { %v568_v27 = vadd.f32 %v952_v21, %v1192_v22  ;;  %v631_v33 = vmax.f32 %v553_v25, 0.0 }
 0x267   :  { %v562_v23 = vpop.f32.mrf.mxu0 }
 0x268   :  { %v563_v24 = vadd.f32 %v1192_v22, %v562_v23  ;;  %v634_v35 = vmax.f32 %v568_v27, 0.0  ;;  %v647_v42 = vmax.f32 %v631_v33, %v632_v37 }
 0x269   :  { %v955_v26 = vpop.f32.mrf.mxu0 }
 0x26a   :  { %v578_v29 = vadd.f32 %v955_v26, %v1192_v22  ;;  %v633_v31 = vmax.f32 %v563_v24, 0.0  ;;  %v648_v51 = vrot.slane %v647_v42, 4 }
 0x26b   :  { %v572_v30 = vpop.f32.mrf.mxu0 }
 0x26c   :  { %v573_v32 = vadd.f32 %v1192_v22, %v572_v30  ;;  %v636_v38 = vmax.f32 %v578_v29, 0.0  ;;  %v654_v41 = vmax.f32 %v633_v31, %v634_v35  ;;  %v649_v63 = vmax.f32 %v647_v42, %v648_v51 }
 0x26d   :  { %v958_v34 = vpop.f32.mrf.mxu0 }
 0x26e   :  { %v635_v36 = vmax.f32 %v573_v32, 0.0  ;;  %v588_v39 = vadd.f32 %v958_v34, %v1192_v22  ;;  %v655_v50 = vrot.slane %v654_v41, 4  ;;  %v650_v12 = vrot.slane %v649_v63, 2 }
 0x26f   :  { %v582_v40 = vpop.f32.mrf.mxu0 }
 0x270   :  { %v661_v43 = vmax.f32 %v635_v36, %v636_v38  ;;  %v583_v44 = vadd.f32 %v1192_v22, %v582_v40  ;;  %v638_v46 = vmax.f32 %v588_v39, 0.0  ;;  %v656_v61 = vmax.f32 %v654_v41, %v655_v50 }
 0x271   :  { %v961_v45 = vpop.f32.mrf.mxu0  ;;  %v651_v28 = vmax.f32 %v649_v63, %v650_v12 }
 0x272   :  { %v637_v47 = vmax.f32 %v583_v44, 0.0  ;;  %v598_v48 = vadd.f32 %v961_v45, %v1192_v22  ;;  %v662_v52 = vrot.slane %v661_v43, 4  ;;  %v657_v9 = vrot.slane %v656_v61, 2 }
 0x273   :  { %v592_v49 = vpop.f32.mrf.mxu0  ;;  %v652_v41 = vrot.slane %v651_v28, 1 }
 0x274   :  { %v668_v53 = vmax.f32 %v637_v47, %v638_v46  ;;  %v593_v54 = vadd.f32 %v1192_v22, %v592_v49  ;;  %v640_v58 = vmax.f32 %v598_v48, 0.0  ;;  %v663_v0 = vmax.f32 %v661_v43, %v662_v52 }
 0x275   :  { %v964_v55 = vpop.f32.mrf.mxu0  ;;  %v658_v24 = vmax.f32 %v656_v61, %v657_v9  ;;  %v653_v50 = vmax.f32 %v651_v28, %v652_v41 }
 0x276   :  { %v608_v56 = vadd.f32 %v964_v55, %v1192_v22  ;;  %v669_v57 = vrot.slane %v668_v53, 4  ;;  %v639_v59 = vmax.f32 %v593_v54, 0.0  ;;  %v664_v13 = vrot.slane %v663_v0, 2 }
 0x277   :  { %v602_v60 = vpop.f32.mrf.mxu0  ;;  %v659_v36 = vrot.slane %v658_v24, 1 }
 0x278   :  { %v603_v62 = vadd.f32 %v1192_v22, %v602_v60  ;;  %v670_v1 = vmax.f32 %v668_v53, %v669_v57  ;;  %v675_v2 = vmax.f32 %v639_v59, %v640_v58  ;;  %v642_v4 = vmax.f32 %v608_v56, 0.0 }
 0x279   :  { %v967_v3 = vpop.f32.mrf.mxu0  ;;  %v665_v29 = vmax.f32 %v663_v0, %v664_v13  ;;  %v660_v46 = vmax.f32 %v658_v24, %v659_v36 }
 0x27a   :  { %v641_v5 = vmax.f32 %v603_v62, 0.0  ;;  %v618_v6 = vadd.f32 %v967_v3, %v1192_v22  ;;  %v676_v7 = vrot.slane %v675_v2, 4  ;;  %v671_v14 = vrot.slane %v670_v1, 2 }
 0x27b   :  { %v612_v8 = vpop.f32.mrf.mxu0  ;;  %v666_v40 = vrot.slane %v665_v29, 1  ;;  %v704_v55 = vsel %vm703_vm2, %v653_v50, %v660_v46 }
 0x27c   :  { %v682_v10 = vmax.f32 %v641_v5, %v642_v4  ;;  %v613_v11 = vadd.f32 %v1192_v22, %v612_v8  ;;  %v677_v15 = vmax.f32 %v675_v2, %v676_v7  ;;  %v644_v18 = vmax.f32 %v618_v6, 0.0 }
 0x27d   :  { %v970_v16 = vpop.f32.mrf.mxu0  ;;  %v672_v30 = vmax.f32 %v670_v1, %v671_v14  ;;  %v667_v49 = vmax.f32 %v665_v29, %v666_v40 }
 0x27e   :  { %v683_v17 = vrot.slane %v682_v10, 4  ;;  %v643_v19 = vmax.f32 %v613_v11, 0.0  ;;  %v628_v20 = vadd.f32 %v970_v16, %v1192_v22  ;;  %v678_v21 = vrot.slane %v677_v15, 2 }
 0x27f   :  { %v622_v23 = vpop.f32.mrf.mxu0  ;;  %v673_v42 = vrot.slane %v672_v30, 1  ;;  %v706_v58 = vsel %vm705_vm3, %v704_v55, %v667_v49 }
 0x280   :  { %v684_v25 = vmax.f32 %v682_v10, %v683_v17  ;;  %v689_v26 = vmax.f32 %v643_v19, %v644_v18  ;;  %v623_v27 = vadd.f32 %v1192_v22, %v622_v23  ;;  %v646_v33 = vmax.f32 %v628_v20, 0.0 }
 0x281   :  { %v679_v35 = vmax.f32 %v677_v15, %v678_v21  ;;  %v674_v51 = vmax.f32 %v672_v30, %v673_v42 }
 0x282   :  { %v685_v31 = vrot.slane %v684_v25, 2  ;;  %v690_v32 = vrot.slane %v689_v26, 4  ;;  %v645_v34 = vmax.f32 %v623_v27, 0.0 }
 0x283   :  { %v680_v45 = vrot.slane %v679_v35, 1  ;;  %v707_v61 = vsel %vm114_vm0, %v706_v58, %v674_v51 }
 0x284   :  { %v686_v37 = vmax.f32 %v684_v25, %v685_v31  ;;  %v691_v38 = vmax.f32 %v689_v26, %v690_v32  ;;  %v696_v39 = vmax.f32 %v645_v34, %v646_v33 }
 0x285   :  { %v681_v54 = vmax.f32 %v679_v35, %v680_v45 }
 0x286   :  { %v692_v43 = vrot.slane %v691_v38, 2  ;;  %v697_v44 = vrot.slane %v696_v39, 4  ;;  %v687_v22 = vrot.slane %v686_v37, 1 }
 0x287   :  { %v709_v62 = vsel %vm708_vm4, %v707_v61, %v681_v54 }
 0x288   :  { %v693_v47 = vmax.f32 %v691_v38, %v692_v43  ;;  %v698_v48 = vmax.f32 %v696_v39, %v697_v44  ;;  %v688_v56 = vmax.f32 %v686_v37, %v687_v22 }
 0x28a   :  { %v694_v52 = vrot.slane %v693_v47, 1  ;;  %v699_v53 = vrot.slane %v698_v48, 2  ;;  %v711_v0 = vsel %vm710_vm5, %v709_v62, %v688_v56 }
 0x28c   :  { %v700_v57 = vmax.f32 %v698_v48, %v699_v53  ;;  %v695_v59 = vmax.f32 %v693_v47, %v694_v52 }
 0x28e   :  { %v701_v60 = vrot.slane %v700_v57, 1  ;;  %v713_v1 = vsel %vm712_vm6, %v711_v0, %v695_v59 }
 0x290   :  { %v702_v63 = vmax.f32 %v700_v57, %v701_v60 }
 0x292   :  { %v715_v2 = vsel %vm714_vm7, %v713_v1, %v702_v63 }
 0x293   :  { %716 = vst [vmem:[#allocation5] sm:$0xff] %v715_v2 }
 0x294   :  { %1006 = shalt.err (!%p1003_p9)
}
 0x295   :  { %726 = dma.vmem_to_hbm [thread:$0]  %s724_s24, 128, %s1221_s7, [#allocation4]  }
 0x296   :  { %1017 = dma.done.wait [#allocation4], 128  }
 0x297   :  { %1018 = vsyncadd [#allocation4], 4294967168 }
 0x298   :  { %730 = vsyncpa [#allocation3], 1 }
 0x299   :  { %731 = vsyncpa [#allocation4], 1 }

</bundles_post_ra>
